<compile_context>
chip_gen: v7x
topology: tpu7x:2x2x1
jax: 0.10.0
libtpu: 0.0.40
codegen_flags: <defaults>
</compile_context>

<pallas_src>
import jax
import jax.numpy as jnp
import numpy as np
from jax.experimental import pallas as pl
from jax.experimental.pallas import tpu as pltpu

HIDDEN = 128


def _round_up(x, m):
    return (x + m - 1) // m * m


def discriminator_kernel(s_ref, a_ref, w1s_ref, w1a_ref, b1_ref,
                         w2_ref, b2_ref, w3_ref, b3_ref, o_ref):
    """3-layer MLP forward for one batch tile, entirely in VMEM.

    s_ref:  (TB, state_dim)    a_ref:  (TB, action_dim)
    w1s/w1a: split rows of W1  -> replaces the host-side concat.
    w3_ref: (1, HIDDEN) row    b3_ref: (1,) f32 scalar in SMEM.
    """
    # --- Layer 1: split matmul == concat([s, a]) @ W1 (f32 accumulation on MXU) ---
    h1 = jnp.dot(s_ref[...], w1s_ref[...], preferred_element_type=jnp.float32)
    h1 = h1 + jnp.dot(a_ref[...], w1a_ref[...], preferred_element_type=jnp.float32)
    h1 = jnp.maximum(h1 + b1_ref[...], 0.0)                      # relu in f32

    # --- Layer 2 ---
    h2 = jnp.dot(h1.astype(w2_ref.dtype), w2_ref[...],
                 preferred_element_type=jnp.float32)
    h2 = jnp.maximum(h2 + b2_ref[...], 0.0)                      # relu in f32

    # --- Layer 3: N=1 matmul moved off the MXU -> VPU multiply + XLU lane-reduce ---
    z = jnp.sum(h2 * w3_ref[...], axis=-1, keepdims=True) + b3_ref[0]
    o_ref[...] = jax.nn.sigmoid(z).astype(o_ref.dtype)           # (TB, 1)


def discriminator_forward(state, action, params, *, tile_b=None, dtype=jnp.float32):
    """Pallas forward. `dtype` controls storage/MXU dtype of the big operands
    (use jnp.bfloat16 on v6e/v7x to halve HBM traffic); accumulation is always f32."""
    w1, b1, w2, b2, w3, b3 = params
    B, state_dim = state.shape
    action_dim = action.shape[1]
    in_dim = state_dim + action_dim

    # Host-side weight prep (cheap, done once per call / folded by jit):
    w1s = w1[:state_dim].astype(dtype)          # (state_dim, 128)
    w1a = w1[state_dim:].astype(dtype)          # (action_dim, 128)
    w2c = w2.astype(dtype)                      # (128, 128)
    b1r = b1.reshape(1, HIDDEN).astype(jnp.float32)
    b2r = b2.reshape(1, HIDDEN).astype(jnp.float32)
    w3r = w3.reshape(1, HIDDEN).astype(jnp.float32)   # row vector for the VPU final layer
    b3s = b3.reshape((1,)).astype(jnp.float32)         # SMEM scalar

    state_c = state.astype(dtype)
    action_c = action.astype(dtype)

    # Batch tile: fixed size (sweepable), multiple of 16 so bf16 sublane packing is legal.
    if tile_b is None:
        tile_b = min(512, _round_up(B, 16))
    assert tile_b % 8 == 0, "tile_b must be a multiple of 8 (16 for bf16)"

    Bp = _round_up(B, tile_b)
    if Bp != B:
        state_c = jnp.pad(state_c, ((0, Bp - B), (0, 0)))
        action_c = jnp.pad(action_c, ((0, Bp - B), (0, 0)))
    grid = (Bp // tile_b,)

    # Advisory cost estimate: 2 big matmuls + small final layer; mostly memory bound.
    bytes_acc = int(
        state_c.size * state_c.dtype.itemsize
        + action_c.size * action_c.dtype.itemsize
        + sum(int(a.size) * a.dtype.itemsize for a in (w1s, w1a, b1r, w2c, b2r, w3r, b3s))
        + Bp * 4)
    cost = pl.CostEstimate(
        flops=2 * Bp * (in_dim * HIDDEN + HIDDEN * HIDDEN + HIDDEN),
        transcendentals=Bp,
        bytes_accessed=bytes_acc)

    out = pl.pallas_call(
        discriminator_kernel,
        out_shape=jax.ShapeDtypeStruct((Bp, 1), jnp.float32),
        grid=grid,
        in_specs=[
            pl.BlockSpec((tile_b, state_dim), lambda i: (i, 0)),     # state tile
            pl.BlockSpec((tile_b, action_dim), lambda i: (i, 0)),    # action tile
            pl.BlockSpec((state_dim, HIDDEN), lambda i: (0, 0)),     # W1[:state_dim]
            pl.BlockSpec((action_dim, HIDDEN), lambda i: (0, 0)),    # W1[state_dim:]
            pl.BlockSpec((1, HIDDEN), lambda i: (0, 0)),             # b1
            pl.BlockSpec((HIDDEN, HIDDEN), lambda i: (0, 0)),        # W2
            pl.BlockSpec((1, HIDDEN), lambda i: (0, 0)),             # b2
            pl.BlockSpec((1, HIDDEN), lambda i: (0, 0)),             # w3 row
            pl.BlockSpec(memory_space=pltpu.MemorySpace.SMEM),       # b3 scalar
        ],
        out_specs=pl.BlockSpec((tile_b, 1), lambda i: (i, 0)),
        compiler_params=pltpu.CompilerParams(
            dimension_semantics=("parallel",),          # batch tiles split across TCs on v7x
            vmem_limit_bytes=32 * 1024 * 1024,          # explicit; safe on v5e/v6e/v7x
        ),
        cost_estimate=cost,
    )(state_c, action_c, w1s, w1a, b1r, w2c, b2r, w3r, b3s)

    return out[:B]


def init_params(key, state_dim, action_dim):
    """Deterministic init mirroring nn.Linear's U(-1/sqrt(fan_in), 1/sqrt(fan_in))."""
    in_dim = state_dim + action_dim
    ks = jax.random.split(key, 6)

    def lin(kw, kb, fan_in, fan_out):
        bound = 1.0 / np.sqrt(fan_in)
        w = jax.random.uniform(kw, (fan_in, fan_out), jnp.float32, -bound, bound)
        b = jax.random.uniform(kb, (1, fan_out), jnp.float32, -bound, bound)
        return w, b

    w1, b1 = lin(ks[0], ks[1], in_dim, HIDDEN)
    w2, b2 = lin(ks[2], ks[3], HIDDEN, HIDDEN)
    w3, b3 = lin(ks[4], ks[5], HIDDEN, 1)
    return (w1, b1, w2, b2, w3, b3)


def reference_forward(state, action, params):
    w1, b1, w2, b2, w3, b3 = params
    x = jnp.concatenate([state, action], axis=1)
    x = jax.nn.relu(x @ w1 + b1)
    x = jax.nn.relu(x @ w2 + b2)
    return jax.nn.sigmoid(x @ w3 + b3)


if __name__ == "__main__":
    key = jax.random.PRNGKey(0)
    B, state_dim, action_dim = 8, 8, 4
    k_s, k_a, k_p, k_s2, k_a2 = jax.random.split(key, 5)

    state = jax.random.normal(k_s, (B, state_dim), jnp.float32)
    action = jax.random.normal(k_a, (B, action_dim), jnp.float32)
    params = init_params(k_p, state_dim, action_dim)

    # Small-shape correctness check (single tile).
    out = jax.block_until_ready(discriminator_forward(state, action, params))
    ref = jax.block_until_ready(reference_forward(state, action, params))
    assert out.shape == (B, 1)
    np.testing.assert_allclose(np.asarray(out), np.asarray(ref), rtol=1e-5, atol=1e-5)

    # Multi-tile parallel grid + ragged batch (padding path), f32.
    B2 = 1000
    state2 = jax.random.normal(k_s2, (B2, state_dim), jnp.float32)
    action2 = jax.random.normal(k_a2, (B2, action_dim), jnp.float32)
    out2 = jax.block_until_ready(
        discriminator_forward(state2, action2, params, tile_b=256))
    ref2 = jax.block_until_ready(reference_forward(state2, action2, params))
    assert out2.shape == (B2, 1)
    np.testing.assert_allclose(np.asarray(out2), np.asarray(ref2), rtol=1e-5, atol=1e-5)

    # bf16 storage / MXU inputs with f32 accumulation (v6e/v7x HBM-traffic win).
    out3 = jax.block_until_ready(
        discriminator_forward(state2, action2, params, tile_b=256, dtype=jnp.bfloat16))
    np.testing.assert_allclose(np.asarray(out3), np.asarray(ref2), rtol=0.0, atol=3e-2)

    print("KERNEL_OK")
</pallas_src>

<mosaic_0001>
module attributes {stable_mosaic.version = 11 : i64} {
  func.func @discriminator_kernel(%arg0: i32, %arg1: memref<16x8xf32, #tpu.memory_space<vmem>>, %arg2: memref<16x4xf32, #tpu.memory_space<vmem>>, %arg3: memref<8x128xf32, #tpu.memory_space<vmem>>, %arg4: memref<4x128xf32, #tpu.memory_space<vmem>>, %arg5: memref<1x128xf32, #tpu.memory_space<vmem>>, %arg6: memref<128x128xf32, #tpu.memory_space<vmem>>, %arg7: memref<1x128xf32, #tpu.memory_space<vmem>>, %arg8: memref<1x128xf32, #tpu.memory_space<vmem>>, %arg9: memref<1xf32, #tpu.memory_space<smem>>, %arg10: memref<16x1xf32, #tpu.memory_space<vmem>>) attributes {dimension_semantics = [#tpu.dimension_semantics<parallel>], iteration_bounds = array<i64: 1>, scalar_prefetch = 0 : i64, scratch_operands = 0 : i64, tpu.core_type = #tpu.core_type<tc>, window_params = [{transform_indices = @transform_0, window_bounds = array<i64: 16, 8>}, {transform_indices = @transform_1, window_bounds = array<i64: 16, 4>}, {pipeline_mode = #tpu.pipeline_mode<synchronous>, transform_indices = @transform_2, window_bounds = array<i64: 8, 128>}, {pipeline_mode = #tpu.pipeline_mode<synchronous>, transform_indices = @transform_3, window_bounds = array<i64: 4, 128>}, {pipeline_mode = #tpu.pipeline_mode<synchronous>, transform_indices = @transform_4, window_bounds = array<i64: 1, 128>}, {pipeline_mode = #tpu.pipeline_mode<synchronous>, transform_indices = @transform_5, window_bounds = array<i64: 128, 128>}, {pipeline_mode = #tpu.pipeline_mode<synchronous>, transform_indices = @transform_6, window_bounds = array<i64: 1, 128>}, {pipeline_mode = #tpu.pipeline_mode<synchronous>, transform_indices = @transform_7, window_bounds = array<i64: 1, 128>}, {transform_indices = @transform_8, window_bounds = array<i64: 1>}, {transform_indices = @transform_9, window_bounds = array<i64: 16, 1>}]} {
    %c0 = arith.constant 0 : index
    %c0_0 = arith.constant 0 : index
    %0 = vector.load %arg1[%c0, %c0_0] : memref<16x8xf32, #tpu.memory_space<vmem>>, vector<16x8xf32>
    %c0_1 = arith.constant 0 : index
    %c0_2 = arith.constant 0 : index
    %1 = vector.load %arg3[%c0_1, %c0_2] : memref<8x128xf32, #tpu.memory_space<vmem>>, vector<8x128xf32>
    %cst = arith.constant dense<0.000000e+00> : vector<16x128xf32>
    %2 = tpu.matmul %0, %1, %cst {dimension_numbers = #tpu.dot_dimension_numbers<[1], [0], [0], [1], [0, 0, 1, 1], [], []>} : vector<16x8xf32>, vector<8x128xf32>, vector<16x128xf32> -> vector<16x128xf32>
    %c0_3 = arith.constant 0 : index
    %c0_4 = arith.constant 0 : index
    %3 = vector.load %arg2[%c0_3, %c0_4] : memref<16x4xf32, #tpu.memory_space<vmem>>, vector<16x4xf32>
    %c0_5 = arith.constant 0 : index
    %c0_6 = arith.constant 0 : index
    %4 = vector.load %arg4[%c0_5, %c0_6] : memref<4x128xf32, #tpu.memory_space<vmem>>, vector<4x128xf32>
    %cst_7 = arith.constant dense<0.000000e+00> : vector<16x128xf32>
    %5 = tpu.matmul %3, %4, %cst_7 {dimension_numbers = #tpu.dot_dimension_numbers<[1], [0], [0], [1], [0, 0, 1, 1], [], []>} : vector<16x4xf32>, vector<4x128xf32>, vector<16x128xf32> -> vector<16x128xf32>
    %6 = arith.addf %2, %5 : vector<16x128xf32>
    %c0_8 = arith.constant 0 : index
    %c0_9 = arith.constant 0 : index
    %7 = vector.load %arg5[%c0_8, %c0_9] : memref<1x128xf32, #tpu.memory_space<vmem>>, vector<1x128xf32>
    %8 = vector.broadcast %7 : vector<1x128xf32> to vector<16x128xf32>
    %9 = arith.addf %6, %8 : vector<16x128xf32>
    %cst_10 = arith.constant 0.000000e+00 : f32
    %10 = vector.broadcast %cst_10 : f32 to vector<16x128xf32>
    %11 = arith.maximumf %9, %10 : vector<16x128xf32>
    %c0_11 = arith.constant 0 : index
    %c0_12 = arith.constant 0 : index
    %12 = vector.load %arg6[%c0_11, %c0_12] : memref<128x128xf32, #tpu.memory_space<vmem>>, vector<128x128xf32>
    %cst_13 = arith.constant dense<0.000000e+00> : vector<16x128xf32>
    %13 = tpu.matmul %11, %12, %cst_13 {dimension_numbers = #tpu.dot_dimension_numbers<[1], [0], [0], [1], [0, 0, 1, 1], [], []>} : vector<16x128xf32>, vector<128x128xf32>, vector<16x128xf32> -> vector<16x128xf32>
    %c0_14 = arith.constant 0 : index
    %c0_15 = arith.constant 0 : index
    %14 = vector.load %arg7[%c0_14, %c0_15] : memref<1x128xf32, #tpu.memory_space<vmem>>, vector<1x128xf32>
    %15 = vector.broadcast %14 : vector<1x128xf32> to vector<16x128xf32>
    %16 = arith.addf %13, %15 : vector<16x128xf32>
    %cst_16 = arith.constant 0.000000e+00 : f32
    %17 = vector.broadcast %cst_16 : f32 to vector<16x128xf32>
    %18 = arith.maximumf %16, %17 : vector<16x128xf32>
    %c0_17 = arith.constant 0 : index
    %c0_18 = arith.constant 0 : index
    %19 = vector.load %arg8[%c0_17, %c0_18] : memref<1x128xf32, #tpu.memory_space<vmem>>, vector<1x128xf32>
    %20 = vector.broadcast %19 : vector<1x128xf32> to vector<16x128xf32>
    %21 = arith.mulf %18, %20 : vector<16x128xf32>
    %cst_19 = arith.constant dense<0.000000e+00> : vector<16xf32>
    %22 = vector.multi_reduction <add>, %21, %cst_19 [1] : vector<16x128xf32> to vector<16xf32>
    %23 = vector.shape_cast %22 : vector<16xf32> to vector<16x1xf32>
    %c0_20 = arith.constant 0 : index
    %24 = memref.load %arg9[%c0_20] : memref<1xf32, #tpu.memory_space<smem>>
    %25 = vector.broadcast %24 : f32 to vector<16x1xf32>
    %26 = arith.addf %23, %25 : vector<16x1xf32>
    %27 = arith.negf %26 : vector<16x1xf32>
    %28 = math.exp %27 : vector<16x1xf32>
    %cst_21 = arith.constant 1.000000e+00 : f32
    %29 = vector.broadcast %cst_21 : f32 to vector<16x1xf32>
    %30 = arith.addf %29, %28 : vector<16x1xf32>
    %31 = arith.divf %29, %30 : vector<16x1xf32>
    %c0_22 = arith.constant 0 : index
    %c0_23 = arith.constant 0 : index
    %32 = vector.load %arg10[%c0_22, %c0_23] : memref<16x1xf32, #tpu.memory_space<vmem>>, vector<16x1xf32>
    tpu.vector_store %arg10[%c0_22, %c0_23], %31 {strides = array<i32>} : memref<16x1xf32, #tpu.memory_space<vmem>>, vector<16x1xf32>,
    return
  }
  func.func @transform_0(%arg0: i32) -> (i32, i32) {
    %c0_i32 = arith.constant 0 : i32
    %c0_i32_0 = arith.constant 0 : i32
    return %arg0, %c0_i32 : i32, i32
  }
  func.func @transform_1(%arg0: i32) -> (i32, i32) {
    %c0_i32 = arith.constant 0 : i32
    %c0_i32_0 = arith.constant 0 : i32
    return %arg0, %c0_i32 : i32, i32
  }
  func.func @transform_2(%arg0: i32) -> (i32, i32) {
    %c0_i32 = arith.constant 0 : i32
    %c0_i32_0 = arith.constant 0 : i32
    %c0_i32_1 = arith.constant 0 : i32
    return %c0_i32, %c0_i32_0 : i32, i32
  }
  func.func @transform_3(%arg0: i32) -> (i32, i32) {
    %c0_i32 = arith.constant 0 : i32
    %c0_i32_0 = arith.constant 0 : i32
    %c0_i32_1 = arith.constant 0 : i32
    return %c0_i32, %c0_i32_0 : i32, i32
  }
  func.func @transform_4(%arg0: i32) -> (i32, i32) {
    %c0_i32 = arith.constant 0 : i32
    %c0_i32_0 = arith.constant 0 : i32
    %c0_i32_1 = arith.constant 0 : i32
    return %c0_i32, %c0_i32_0 : i32, i32
  }
  func.func @transform_5(%arg0: i32) -> (i32, i32) {
    %c0_i32 = arith.constant 0 : i32
    %c0_i32_0 = arith.constant 0 : i32
    %c0_i32_1 = arith.constant 0 : i32
    return %c0_i32, %c0_i32_0 : i32, i32
  }
  func.func @transform_6(%arg0: i32) -> (i32, i32) {
    %c0_i32 = arith.constant 0 : i32
    %c0_i32_0 = arith.constant 0 : i32
    %c0_i32_1 = arith.constant 0 : i32
    return %c0_i32, %c0_i32_0 : i32, i32
  }
  func.func @transform_7(%arg0: i32) -> (i32, i32) {
    %c0_i32 = arith.constant 0 : i32
    %c0_i32_0 = arith.constant 0 : i32
    %c0_i32_1 = arith.constant 0 : i32
    return %c0_i32, %c0_i32_0 : i32, i32
  }
  func.func @transform_8(%arg0: i32) -> i32 {
    %c0_i32 = arith.constant 0 : i32
    %c0_i32_0 = arith.constant 0 : i32
    return %c0_i32 : i32
  }
  func.func @transform_9(%arg0: i32) -> (i32, i32) {
    %c0_i32 = arith.constant 0 : i32
    %c0_i32_0 = arith.constant 0 : i32
    return %arg0, %c0_i32 : i32, i32
  }
}

</mosaic_0001>

<bundles_post_ra>
// kernel: tpu_custom_call.1
= control target key start
LH: loop header
LB: loop body
LE: loop exit
PB: predicated region body
PF: predicated region fallthrough
CT: control target
= control target key end

     0   :  { %15 = vsyncpa [#allocation4], 0  ;;  %s517_s30 = smov [#allocation3]   ;;  %s620_s0 = inlined_call_operand.vmem [shape: f32[16,8], index: 0, kind: input, shape index: {}]   ;;  %s621_s1 = inlined_call_operand.vmem [shape: f32[16,4], index: 1, kind: input, shape index: {}]   ;;  %s622_s2 = inlined_call_operand.vmem [shape: f32[8,128], index: 2, kind: input, shape index: {}]   ;;  %s623_s3 = inlined_call_operand.vmem [shape: f32[4,128], index: 3, kind: input, shape index: {}]   ;;  %s624_s4 = inlined_call_operand.vmem [shape: f32[1,128], index: 4, kind: input, shape index: {}]   ;;  %s625_s5 = inlined_call_operand.hbm [shape: f32[128,128], index: 5, kind: input, shape index: {}]   ;;  %s626_s6 = inlined_call_operand.vmem [shape: f32[1,128], index: 6, kind: input, shape index: {}]   ;;  %s627_s7 = inlined_call_operand.vmem [shape: f32[1,128], index: 7, kind: input, shape index: {}]   ;;  %s628_s8 = inlined_call_operand.<no memory space> [shape: f32[1], index: 8, kind: input, shape index: {}]   ;;  %s629_s9 = inlined_call_operand.vmem [shape: f32[16,1], index: 9, kind: output, shape index: {}]  }
   0x1   :  { %s31_s10 = sshll.u32 %s517_s30, 4  ;;  %s493_s13 = scalar_lea.hbm %s625_s5, 2048  ;;  %s32_s10 = int_to_ptr.vmem [resolvable:$true] %s31_s10 }
   0x2   :  { %p494_p0 = scmp.ne.s32.totalorder %s625_s5, %s493_s13  ;;  %p497_p1 = scmp.lt.u32.totalorder %s493_s13, %s625_s5 }
   0x4   :  { %p499_p2 = pnand %p497_p1, %p494_p0 }
   0x6   :  { %502 = shalt.err (!%p499_p2)
}
   0x7   :  { %s503_s18 = scalar_lea.vmem %s32_s10, 2048  ;;  %p508_p4 = scmp.lt.s32.totalorder %s32_s10, %s32_s10 }
   0x8   :  { %p504_p3 = scmp.ne.s32.totalorder %s32_s10, %s503_s18  ;;  %p509_p5 = scmp.lt.s32.totalorder %s503_s18, %s503_s18 }
   0xa   :  { %p510_p6 = por %p509_p5, %p508_p4 }
   0xc   :  { %p511_p7 = pnand %p510_p6, %p504_p3 }
   0xe   :  { %514 = shalt.err (!%p511_p7)
}
   0xf   :  { %s518_s19 = smov 128   ;;  %s519_s20 = smov 8  }
  0x10   :  { %37 = dma.hbm_to_vmem [thread:$0]  %s625_s5, 2048, %s32_s10, [#allocation4], %s518_s19, %s518_s19, %s519_s20  }
  0x11   :  { %515 = dma.done.wait [#allocation4], 2048  }
  0x12   :  { %516 = vsyncadd [#allocation4], 4294965248  ;;  %vm60_vm0 = vcmask 1043456   ;;  %vm53_vm1 = vcmask 31744   ;;  %v52_v0 = vld [vmem:[%s623_s3] sm:$0xf]  ;;  %v346_v47 = vstv %s628_s8 }
  0x13   :  { %v50_v1 = vld [vmem:[%s621_s1] sm:$0xff]  ;;  %v51_v2 = vld [vmem:[%s621_s1 + $0x8] sm:$0xff]  ;;  %403 = vmatprep.subr.msk.mxu0 %vm60_vm0, %v52_v0  ;;  %vm139_vm2 = vcmask 64512   ;;  %v234_v7 = vld [vmem:[#allocation3 + $0x10] sm:$0xff]  ;;  %vm361_vm3 = vcmask 7168  }
  0x14   :  { %405 = vmatprep.mubr.msk.f32.mxu0 %vm53_vm1, %v50_v1  ;;  %v49_v3 = vld [vmem:[%s622_s2] sm:$0xff]  ;;  %404 = vmatpush3.msk.msra.mxu0 %vm60_vm0, %v52_v0  ;;  %v233_v6 = vld [vmem:[#allocation3 + $0x8] sm:$0xff]  ;;  %v235_v9 = vld [vmem:[#allocation3 + $0x18] sm:$0xff] }
  0x15   :  { %v47_v4 = vld [vmem:[%s620_s0] sm:$0xff]  ;;  %406 = vmatmul.mubr.msk.f32.vlgmr.msra.gmra.mrb[0].mxu0 %vm53_vm1, %v51_v2  ;;  %408 = vmatprep.subr.mxu0 %v49_v3  ;;  %v452_v10 = vpack.c.bf16 %v235_v9, %v234_v7  ;;  %v237_v12 = vld [vmem:[#allocation3 + $0x28] sm:$0xff]  ;;  %v238_v15 = vld [vmem:[#allocation3 + $0x30] sm:$0xff] }
  0x16   :  { %v232_v5 = vld [vmem:[#allocation3] sm:$0xff]  ;;  %409 = vmatpush3.msra.mxu0 %v49_v3  ;;  %410 = vmatprep.mubr.msk.f32.mxu0 %vm139_vm2, %v47_v4  ;;  %v48_v14 = vld [vmem:[%s620_s0 + $0x8] sm:$0xff]  ;;  %v239_v16 = vld [vmem:[#allocation3 + $0x38] sm:$0xff] }
  0x17   :  { %v448_v8 = vpack.c.bf16 %v233_v6, %v232_v5  ;;  %v236_v11 = vld [vmem:[#allocation3 + $0x20] sm:$0xff]  ;;  %v460_v17 = vpack.c.bf16 %v239_v16, %v238_v15  ;;  %v241_v19 = vld [vmem:[#allocation3 + $0x48] sm:$0xff]  ;;  %v242_v21 = vld [vmem:[#allocation3 + $0x50] sm:$0xff] }
  0x18   :  { %v456_v13 = vpack.c.bf16 %v237_v12, %v236_v11  ;;  %v240_v18 = vld [vmem:[#allocation3 + $0x40] sm:$0xff]  ;;  %v243_v22 = vld [vmem:[#allocation3 + $0x58] sm:$0xff]  ;;  %v245_v25 = vld [vmem:[#allocation3 + $0x68] sm:$0xff] }
  0x19   :  { %449 = vmatprep.subr.bf16.mxu1 %v448_v8  ;;  %v464_v20 = vpack.c.bf16 %v241_v19, %v240_v18  ;;  %v468_v23 = vpack.c.bf16 %v243_v22, %v242_v21  ;;  %v244_v24 = vld [vmem:[#allocation3 + $0x60] sm:$0xff]  ;;  %v246_v27 = vld [vmem:[#allocation3 + $0x70] sm:$0xff]  ;;  %v247_v28 = vld [vmem:[#allocation3 + $0x78] sm:$0xff] }
  0x1a   :  { %451 = vmatpush3.bf16.msra.mxu1 %v448_v8  ;;  %v472_v26 = vpack.c.bf16 %v245_v25, %v244_v24  ;;  %v476_v29 = vpack.c.bf16 %v247_v28, %v246_v27  ;;  %v374_v30 = vld [vmem:[%s624_s4] ss:$0 sm:$0xff] }
  0x1b   :  { %453 = vmatprep.subr.bf16.mxu1 %v452_v10  ;;  %v375_v37 = vld [vmem:[%s626_s6] ss:$0 sm:$0xff] }
  0x1c   :  { %v376_v42 = vld [vmem:[%s627_s7] ss:$0 sm:$0xff] }
  0x1d   :  { %411 = vmatmul.mubr.msk.f32.vlgmr.msra.gmra.mrb[0].mxu0 %vm139_vm2, %v48_v14 }
  0x1e   :  { %455 = vmatpush3.bf16.msra.mxu1 %v452_v10 }
  0x1f   :  { %457 = vmatprep.subr.bf16.mxu1 %v456_v13 }
  0x22   :  { %459 = vmatpush3.bf16.msra.mxu1 %v456_v13 }
  0x23   :  { %461 = vmatprep.subr.bf16.mxu1 %v460_v17 }
  0x26   :  { %463 = vmatpush3.bf16.msra.mxu1 %v460_v17 }
  0x27   :  { %465 = vmatprep.subr.bf16.mxu1 %v464_v20 }
  0x2a   :  { %467 = vmatpush3.bf16.msra.mxu1 %v464_v20 }
  0x2b   :  { %469 = vmatprep.subr.bf16.mxu1 %v468_v23 }
  0x2e   :  { %471 = vmatpush3.bf16.msra.mxu1 %v468_v23 }
  0x2f   :  { %473 = vmatprep.subr.bf16.mxu1 %v472_v26 }
  0x32   :  { %475 = vmatpush3.bf16.msra.mxu1 %v472_v26 }
  0x33   :  { %477 = vmatprep.subr.bf16.mxu1 %v476_v29 }
  0x36   :  { %479 = vmatpush3.bf16.msra.mxu1 %v476_v29 }
  0xf0   :  { %v412_v31 = vpop.f32.mrb[0].mxu0 }
  0xf1   :  { %v229_v32 = vadd.f32 %v412_v31, %v374_v30  ;;  %v212_v33 = vpop.f32.mrb[1].mxu0 }
  0xf2   :  { %v228_v34 = vadd.f32 %v374_v30, %v212_v33 }
  0xf3   :  { %v231_v36 = vmax.f32 %v229_v32, 0.0 }
  0xf4   :  { %v230_v35 = vmax.f32 %v228_v34, 0.0 }
  0xf6   :  { %445 = vmatprep.mubr.f32.mxu1 %v230_v35 }
  0xf7   :  { %446 = vmatmul.mubr.f32.vlgmr.msra.gmra.mrb[0].mxu1 %v231_v36 }
 0x1ca   :  { %v447_v38 = vpop.f32.mrb[0].mxu1 }
 0x1cb   :  { %v321_v39 = vpop.f32.mrb[1].mxu1  ;;  %v327_v40 = vadd.f32 %v447_v38, %v375_v37 }
 0x1cc   :  { %v322_v41 = vadd.f32 %v375_v37, %v321_v39 }
 0x1cd   :  { %v331_v44 = vmax.f32 %v327_v40, 0.0 }
 0x1ce   :  { %v330_v43 = vmax.f32 %v322_v41, 0.0 }
 0x1cf   :  { %v340_v46 = vmul.f32 %v376_v42, %v331_v44 }
 0x1d0   :  { %v339_v45 = vmul.f32 %v376_v42, %v330_v43 }
 0x1d2   :  { %341 = vadd.xlane.f32.xlu0 %v339_v45 }
 0x1d6   :  { %343 = vadd.xlane.f32.xlu0 %v340_v46 }
 0x25f   :  { %v342_v48 = vpop.xlane.xlu0 %341 }
 0x260   :  { %v347_v49 = vadd.f32 %v346_v47, %v342_v48 }
 0x262   :  { %v377_v50 = vmul.f32 -1.442695, %v347_v49 }
 0x263   :  { %v344_v51 = vpop.xlane.xlu0 %343 }
 0x264   :  { %485 = vpow2.f32 %v377_v50  ;;  %v348_v52 = vadd.f32 %v346_v47, %v344_v51 }
 0x266   :  { %v378_v53 = vmul.f32 -1.442695, %v348_v52 }
 0x268   :  { %487 = vpow2.f32 %v378_v53 }
 0x26e   :  { %v486_v54 = vpop.eup %485 }
 0x26f   :  { %v355_v55 = vadd.f32 1.0, %v486_v54 }
 0x271   :  { %489 = vrcp.f32 %v355_v55 }
 0x272   :  { %v488_v56 = vpop.eup %487 }
 0x273   :  { %v356_v57 = vadd.f32 1.0, %v488_v56 }
 0x275   :  { %491 = vrcp.f32 %v356_v57 }
 0x27b   :  { %v490_v58 = vpop.eup %489 }
 0x27c   :  { %362 = vst.msk [vmem:[%s629_s9] sm:$0xff] %vm361_vm3, %v490_v58 }
 0x27f   :  { %v492_v59 = vpop.eup %491 }
 0x280   :  { %363 = vst.msk [vmem:[%s629_s9 + $0x8] sm:$0xff] %vm361_vm3, %v492_v59 }
 0x281   :  { %368 = vsyncpa [#allocation4], 1 }

</bundles_post_ra>
